<compile_context>
chip_gen: v7x
topology: tpu7x:2x2x1
jax: 0.10.0
libtpu: 0.0.40
codegen_flags: <defaults>
</compile_context>

<pallas_src>
import jax
import jax.numpy as jnp
from jax.experimental import pallas as pl
from jax.experimental.pallas import tpu as pltpu


def _gttn_forward_kernel(x_ref, w1_ref, b1_ref, w2_ref, b2_ref, out_ref):
    # First layer: (B, D_in) @ (D_in, H) on the MXU, bias + ReLU on the VPU.
    hidden = jnp.dot(x_ref[...], w1_ref[...], preferred_element_type=jnp.float32)
    hidden = jnp.maximum(hidden + b1_ref[...], 0.0)
    # Task head: (B, H) @ (H, C) on the MXU, bias epilogue on the VPU.
    out = jnp.dot(hidden, w2_ref[...], preferred_element_type=jnp.float32)
    out_ref[...] = (out + b2_ref[...]).astype(out_ref.dtype)


def gttn_equal_net_forward(inputs, hidden_w, hidden_b, cls_weight, cls_bias, task_index):
    """Pallas equivalent of GTTN_equal_net.forward(inputs, task_index).

    inputs:      (B, input_dim)  (or (input_dim,) -> promoted to (1, input_dim))
    hidden_w:    (hidden_dim, input_dim)   -- nn.Linear weight layout
    hidden_b:    (hidden_dim,)
    cls_weight:  (task_num, class_num, hidden_dim)
    cls_bias:    (task_num, class_num)
    """
    if inputs.ndim < 2:
        inputs = inputs[None, :]
    B = inputs.shape[0]
    H, _ = hidden_w.shape
    C = cls_weight.shape[1]

    # Layout plumbing in plain JAX (fused by XLA into the operand feed): task slice,
    # transposes, and 2-D bias rows so the kernel body is pure matmul + epilogue.
    w1_t = hidden_w.T                       # (D_in, H)
    b1 = hidden_b.reshape(1, H)             # (1, H)
    w2_t = cls_weight[task_index].T         # (H, C)
    b2 = cls_bias[task_index].reshape(1, C)  # (1, C)

    vmem_spec = pl.BlockSpec(memory_space=pltpu.MemorySpace.VMEM)
    out = pl.pallas_call(
        _gttn_forward_kernel,
        out_shape=jax.ShapeDtypeStruct((B, C), inputs.dtype),
        in_specs=[vmem_spec] * 5,
        out_specs=vmem_spec,
    )(inputs, w1_t, b1, w2_t, b2)
    return out


if __name__ == "__main__":
    # Small deterministic shapes consistent with the module
    # (hidden_dim = 7*7*4 = 196 matches the reshape in get_regular_term).
    batch, input_dim, hidden_dim, class_num, task_num = 2, 64, 196, 4, 3
    task_index = 1

    key = jax.random.PRNGKey(0)
    k1, k2, k3, k4, k5 = jax.random.split(key, 5)
    x = jax.random.normal(k1, (batch, input_dim), dtype=jnp.float32)
    hidden_w = jax.random.normal(k2, (hidden_dim, input_dim), dtype=jnp.float32) * 0.05
    hidden_b = jax.random.normal(k3, (hidden_dim,), dtype=jnp.float32) * 0.05
    cls_weight = jax.random.normal(k4, (task_num, class_num, hidden_dim), dtype=jnp.float32) * 0.05
    cls_bias = jax.random.normal(k5, (task_num, class_num), dtype=jnp.float32) * 0.05

    out = gttn_equal_net_forward(x, hidden_w, hidden_b, cls_weight, cls_bias, task_index)
    out = jax.block_until_ready(out)

    # Pure-JAX reference (highest precision to avoid default-matmul-precision noise).
    hidden_ref = jnp.maximum(
        jnp.dot(x, hidden_w.T, precision="highest") + hidden_b, 0.0)
    out_ref = jnp.dot(hidden_ref, cls_weight[task_index].T,
                      precision="highest") + cls_bias[task_index]

    assert out.shape == (batch, class_num)
    assert jnp.allclose(out, out_ref, atol=1e-2, rtol=1e-2), (out, out_ref)

    # TODO(synk): get_regular_term() (SVD-based nuclear norms of tensor unfoldings)
    # is not part of forward() and has no Pallas equivalent (torch.svd); omitted.
    print("KERNEL_OK")
</pallas_src>

<mosaic_0001>
module attributes {stable_mosaic.version = 11 : i64} {
  func.func @_gttn_forward_kernel(%arg0: memref<2x64xf32, #tpu.memory_space<vmem>>, %arg1: memref<64x196xf32, #tpu.memory_space<vmem>>, %arg2: memref<1x196xf32, #tpu.memory_space<vmem>>, %arg3: memref<196x4xf32, #tpu.memory_space<vmem>>, %arg4: memref<1x4xf32, #tpu.memory_space<vmem>>, %arg5: memref<2x4xf32, #tpu.memory_space<vmem>>) attributes {dimension_semantics = [], scalar_prefetch = 0 : i64, scratch_operands = 0 : i64, tpu.core_type = #tpu.core_type<tc>} {
    %c0 = arith.constant 0 : index
    %c0_0 = arith.constant 0 : index
    %0 = vector.load %arg0[%c0, %c0_0] : memref<2x64xf32, #tpu.memory_space<vmem>>, vector<2x64xf32>
    %c0_1 = arith.constant 0 : index
    %c0_2 = arith.constant 0 : index
    %1 = vector.load %arg1[%c0_1, %c0_2] : memref<64x196xf32, #tpu.memory_space<vmem>>, vector<64x196xf32>
    %cst = arith.constant dense<0.000000e+00> : vector<2x196xf32>
    %2 = tpu.matmul %0, %1, %cst {dimension_numbers = #tpu.dot_dimension_numbers<[1], [0], [0], [1], [0, 0, 1, 1], [], []>} : vector<2x64xf32>, vector<64x196xf32>, vector<2x196xf32> -> vector<2x196xf32>
    %c0_3 = arith.constant 0 : index
    %c0_4 = arith.constant 0 : index
    %3 = vector.load %arg2[%c0_3, %c0_4] : memref<1x196xf32, #tpu.memory_space<vmem>>, vector<1x196xf32>
    %4 = vector.broadcast %3 : vector<1x196xf32> to vector<2x196xf32>
    %5 = arith.addf %2, %4 : vector<2x196xf32>
    %cst_5 = arith.constant 0.000000e+00 : f32
    %6 = vector.broadcast %cst_5 : f32 to vector<2x196xf32>
    %7 = arith.maximumf %5, %6 : vector<2x196xf32>
    %c0_6 = arith.constant 0 : index
    %c0_7 = arith.constant 0 : index
    %8 = vector.load %arg3[%c0_6, %c0_7] : memref<196x4xf32, #tpu.memory_space<vmem>>, vector<196x4xf32>
    %cst_8 = arith.constant dense<0.000000e+00> : vector<2x4xf32>
    %9 = tpu.matmul %7, %8, %cst_8 {dimension_numbers = #tpu.dot_dimension_numbers<[1], [0], [0], [1], [0, 0, 1, 1], [], []>} : vector<2x196xf32>, vector<196x4xf32>, vector<2x4xf32> -> vector<2x4xf32>
    %c0_9 = arith.constant 0 : index
    %c0_10 = arith.constant 0 : index
    %10 = vector.load %arg4[%c0_9, %c0_10] : memref<1x4xf32, #tpu.memory_space<vmem>>, vector<1x4xf32>
    %11 = vector.broadcast %10 : vector<1x4xf32> to vector<2x4xf32>
    %12 = arith.addf %9, %11 : vector<2x4xf32>
    %c0_11 = arith.constant 0 : index
    %c0_12 = arith.constant 0 : index
    %13 = vector.load %arg5[%c0_11, %c0_12] : memref<2x4xf32, #tpu.memory_space<vmem>>, vector<2x4xf32>
    tpu.vector_store %arg5[%c0_11, %c0_12], %12 {strides = array<i32>} : memref<2x4xf32, #tpu.memory_space<vmem>>, vector<2x4xf32>,
    return
  }
}

</mosaic_0001>

<bundles_post_ra>
// kernel: tpu_custom_call.1
= control target key start
LH: loop header
LB: loop body
LE: loop exit
PB: predicated region body
PF: predicated region fallthrough
CT: control target
= control target key end

     0   :  { %v336_v7 = vmov 0.0   ;;  %v337_v8 = vmov 0.0|0.0   ;;  %s527_s0 = inlined_call_operand.vmem [shape: f32[2,64], index: 0, kind: input, shape index: {}]   ;;  %s528_s1 = inlined_call_operand.vmem [shape: f32[64,196], index: 1, kind: input, shape index: {}]   ;;  %s529_s2 = inlined_call_operand.vmem [shape: f32[1,196], index: 2, kind: input, shape index: {}]   ;;  %s530_s3 = inlined_call_operand.vmem [shape: f32[196,4], index: 3, kind: input, shape index: {}]   ;;  %s531_s4 = inlined_call_operand.vmem [shape: f32[1,4], index: 4, kind: input, shape index: {}]   ;;  %s532_s5 = inlined_call_operand.hbm [shape: f32[2,4], index: 5, kind: output, shape index: {}]  }
   0x1   :  { %v23_v0 = vld [vmem:[%s528_s1 + $0x8] sm:$0xff]  ;;  %v25_v1 = vld [vmem:[%s528_s1 + $0x18] sm:$0xff]  ;;  %v22_v2 = vld [vmem:[%s528_s1] sm:$0xff]  ;;  %118 = vmatprep.mubr.f32.mxu0 %v336_v7  ;;  %273 = vmatprep.subr.bf16.mxu1 %v337_v8 }
   0x2   :  { %v257_v3 = vpack.c.bf16 %v25_v1, %v23_v0  ;;  %v24_v4 = vld [vmem:[%s528_s1 + $0x10] sm:$0xff]  ;;  %v27_v5 = vld [vmem:[%s528_s1 + $0x28] sm:$0xff]  ;;  %v29_v6 = vld [vmem:[%s528_s1 + $0x38] sm:$0xff] }
   0x3   :  { %v259_v9 = vpack.c.bf16 %v24_v4, %v22_v2  ;;  %v261_v10 = vpack.c.bf16 %v29_v6, %v27_v5  ;;  %v26_v11 = vld [vmem:[%s528_s1 + $0x20] sm:$0xff]  ;;  %v28_v12 = vld [vmem:[%s528_s1 + $0x30] sm:$0xff]  ;;  %v31_v13 = vld [vmem:[%s528_s1 + $0x48] sm:$0xff] }
   0x4   :  { %258 = vmatprep.subr.bf16.mxu0 %v257_v3  ;;  %v33_v14 = vld [vmem:[%s528_s1 + $0x58] sm:$0xff]  ;;  %v263_v15 = vpack.c.bf16 %v28_v12, %v26_v11  ;;  %v30_v16 = vld [vmem:[%s528_s1 + $0x40] sm:$0xff]  ;;  %v32_v17 = vld [vmem:[%s528_s1 + $0x50] sm:$0xff] }
   0x5   :  { %260 = vmatpush1.bf16.msra.mxu0 %v259_v9  ;;  %v265_v18 = vpack.c.bf16 %v33_v14, %v31_v13  ;;  %v35_v19 = vld [vmem:[%s528_s1 + $0x68] sm:$0xff]  ;;  %v37_v20 = vld [vmem:[%s528_s1 + $0x78] sm:$0xff]  ;;  %v127_v21 = vld [vmem:[%s530_s3] sm:$0xff]  ;;  %v267_v26 = vpack.c.bf16 %v32_v17, %v30_v16 }
   0x6   :  { %262 = vmatprep.subr.bf16.mxu0 %v261_v10  ;;  %v128_v22 = vld [vmem:[%s530_s3 + $0x8] sm:$0xff]  ;;  %v129_v23 = vld [vmem:[%s530_s3 + $0x10] sm:$0xff]  ;;  %v130_v24 = vld [vmem:[%s530_s3 + $0x18] sm:$0xff]  ;;  %v269_v27 = vpack.c.bf16 %v37_v20, %v35_v19 }
   0x7   :  { %v274_v25 = vpack.c.bf16 %v128_v22, %v127_v21  ;;  %v34_v28 = vld [vmem:[%s528_s1 + $0x60] sm:$0xff]  ;;  %v36_v29 = vld [vmem:[%s528_s1 + $0x70] sm:$0xff]  ;;  %v277_v30 = vpack.c.bf16 %v130_v24, %v129_v23  ;;  %v132_v32 = vld [vmem:[%s530_s3 + $0x28] sm:$0xff] }
   0x8   :  { %v131_v31 = vld [vmem:[%s530_s3 + $0x20] sm:$0xff]  ;;  %v271_v33 = vpack.c.bf16 %v36_v29, %v34_v28 }
   0x9   :  { %264 = vmatpush1.bf16.msra.mxu0 %v263_v15  ;;  %275 = vmatpush1.bf16.msra.mxu1 %v274_v25  ;;  %v280_v34 = vpack.c.bf16 %v132_v32, %v131_v31 }
   0xa   :  { %266 = vmatprep.subr.bf16.mxu0 %v265_v18  ;;  %276 = vmatprep.subr.bf16.mxu1 %v337_v8 }
   0xd   :  { %268 = vmatpush1.bf16.msra.mxu0 %v267_v26  ;;  %278 = vmatpush1.bf16.msra.mxu1 %v277_v30 }
   0xe   :  { %270 = vmatprep.subr.bf16.mxu0 %v269_v27 }
   0xf   :  { %10 = vsyncpa [#allocation3], 0  ;;  %279 = vmatprep.subr.bf16.mxu1 %v337_v8  ;;  %v133_v35 = vld [vmem:[%s530_s3 + $0x30] sm:$0xff]  ;;  %v134_v36 = vld [vmem:[%s530_s3 + $0x38] sm:$0xff]  ;;  %vm50_vm0 = vcmask 523264   ;;  %vm163_vm1 = vcmask 1043456   ;;  %v40_v0 = vlaneseq }
  0x10   :  { %v21_v37 = vld [vmem:[%s527_s0] sm:$0x3]  ;;  %v283_v38 = vpack.c.bf16 %v134_v36, %v133_v35  ;;  %v136_v40 = vld [vmem:[%s530_s3 + $0x48] sm:$0xff]  ;;  %v137_v42 = vld [vmem:[%s530_s3 + $0x50] sm:$0xff]  ;;  %vm159_vm2 = vcmask 556032   ;;  %s338_s26 = smov [#allocation2]  }
  0x11   :  { %272 = vmatpush1.bf16.msra.mxu0 %v271_v33  ;;  %281 = vmatpush1.bf16.msra.mxu1 %v280_v34  ;;  %v135_v39 = vld [vmem:[%s530_s3 + $0x40] sm:$0xff]  ;;  %v138_v43 = vld [vmem:[%s530_s3 + $0x58] sm:$0xff]  ;;  %v140_v46 = vld [vmem:[%s530_s3 + $0x68] sm:$0xff]  ;;  %v41_v1 = vshrl.u32 %v40_v0, 7  ;;  %s245_s27 = sshll.u32 %s338_s26, 4  ;;  %vm237_vm3 = vcmask 25600   ;;  %s246_s27 = int_to_ptr.vmem [resolvable:$true] %s245_s27 }
  0x12   :  { %282 = vmatprep.subr.bf16.mxu1 %v337_v8  ;;  %v286_v41 = vpack.c.bf16 %v136_v40, %v135_v39  ;;  %v289_v44 = vpack.c.bf16 %v138_v43, %v137_v42  ;;  %v139_v45 = vld [vmem:[%s530_s3 + $0x60] sm:$0xff]  ;;  %v141_v48 = vld [vmem:[%s530_s3 + $0x70] sm:$0xff]  ;;  %v142_v49 = vld [vmem:[%s530_s3 + $0x78] sm:$0xff]  ;;  %p317_p1 = scmp.lt.s32.totalorder %s246_s27, %s246_s27 }
  0x13   :  { %v292_v47 = vpack.c.bf16 %v140_v46, %v139_v45  ;;  %v295_v50 = vpack.c.bf16 %v142_v49, %v141_v48  ;;  %v143_v51 = vld [vmem:[%s530_s3 + $0x80] sm:$0xff]  ;;  %v144_v52 = vld [vmem:[%s530_s3 + $0x88] sm:$0xff]  ;;  %v145_v54 = vld [vmem:[%s530_s3 + $0x90] sm:$0xff]  ;;  %v42_v2 = vsub.s32 0, %v41_v1  ;;  %v46_v4 = vsub.s32 1, %v41_v1 }
  0x14   :  { %253 = vmatmul.mubr.msk.f32.vlgmr.msra.gmra.mrb[0].mxu0 %vm50_vm0, %v21_v37  ;;  %v298_v53 = vpack.c.bf16 %v144_v52, %v143_v51  ;;  %v146_v55 = vld [vmem:[%s530_s3 + $0x98] sm:$0xff]  ;;  %v147_v57 = vld [vmem:[%s530_s3 + $0xa0] sm:$0xff]  ;;  %v148_v58 = vld [vmem:[%s530_s3 + $0xa8] sm:$0xff] }
  0x15   :  { %284 = vmatpush1.bf16.msra.mxu1 %v283_v38  ;;  %v301_v56 = vpack.c.bf16 %v146_v55, %v145_v54  ;;  %v304_v59 = vpack.c.bf16 %v148_v58, %v147_v57  ;;  %v149_v60 = vld [vmem:[%s530_s3 + $0xb0] sm:$0xff]  ;;  %v150_v61 = vld [vmem:[%s530_s3 + $0xb8] sm:$0xff]  ;;  %v151_v63 = vld [vmem:[%s530_s3 + $0xc0] sm:$0xf] }
  0x16   :  { %285 = vmatprep.subr.bf16.mxu1 %v337_v8  ;;  %v307_v62 = vpack.c.bf16 %v150_v61, %v149_v60  ;;  %v38_v3 = vld [vmem:[%s529_s2] sm:$0x3]  ;;  %s312_s2 = scalar_lea.vmem %s246_s27, 32 }
  0x17   :  { %v43_v5 = vrot.slane %v38_v3, %v42_v2  ;;  %v47_v6 = vrot.slane %v38_v3, %v46_v4  ;;  %v254_v13 = vld [vmem:[%s531_s4] ss:$0 sm:$0xff]  ;;  %p313_p0 = scmp.ne.s32.totalorder %s246_s27, %s312_s2  ;;  %p318_p2 = scmp.lt.s32.totalorder %s312_s2, %s312_s2 }
  0x19   :  { %287 = vmatpush1.bf16.msra.mxu1 %v286_v41  ;;  %p319_p3 = por %p318_p2, %p317_p1 }
  0x1a   :  { %288 = vmatprep.subr.bf16.mxu1 %v337_v8 }
  0x1b   :  { %p320_p4 = pnand %p319_p3, %p313_p0 }
  0x1d   :  { %290 = vmatpush1.bf16.msra.mxu1 %v289_v44 }
  0x1e   :  { %291 = vmatprep.subr.bf16.mxu1 %v337_v8 }
  0x21   :  { %293 = vmatpush1.bf16.msra.mxu1 %v292_v47 }
  0x22   :  { %294 = vmatprep.subr.bf16.mxu1 %v337_v8 }
  0x25   :  { %296 = vmatpush1.bf16.msra.mxu1 %v295_v50 }
  0x26   :  { %297 = vmatprep.subr.bf16.mxu1 %v337_v8 }
  0x29   :  { %299 = vmatpush1.bf16.msra.mxu1 %v298_v53 }
  0x2a   :  { %300 = vmatprep.subr.bf16.mxu1 %v337_v8 }
  0x2d   :  { %302 = vmatpush1.bf16.msra.mxu1 %v301_v56 }
  0x2e   :  { %303 = vmatprep.subr.bf16.mxu1 %v337_v8 }
  0x31   :  { %305 = vmatpush1.bf16.msra.mxu1 %v304_v59 }
  0x32   :  { %306 = vmatprep.subr.bf16.mxu1 %v337_v8 }
  0x35   :  { %308 = vmatpush1.bf16.msra.mxu1 %v307_v62 }
  0x36   :  { %215 = vmatprep.subr.mxu1 %v336_v7 }
  0x39   :  { %255 = vmatpush1.msk.msra.mxu1 %vm163_vm1, %v151_v63 }
  0xe7   :  { %v120_v8 = vpop.f32.mrb[0].mxu0 }
  0xe8   :  { %v121_v9 = vadd.f32 %v120_v8, %v43_v5  ;;  %v122_v10 = vpop.f32.mrb[1].mxu0 }
  0xe9   :  { %v123_v7 = vadd.f32 %v122_v10, %v47_v6 }
  0xea   :  { %v125_v12 = vmax.f32 %v121_v9, 0.0 }
  0xeb   :  { %v126_v11 = vmax.f32 %v123_v7, 0.0 }
  0xed   :  { %256 = vmatprep.mubr.msk.f32.mxu1 %vm159_vm2, %v126_v11 }
  0xee   :  { %232 = vmatmul.mubr.f32.vlgmr.msra.gmra.mrb[0].mxu1 %v125_v12 }
 0x1c1   :  { %v233_v14 = vpop.f32.mrb[0].mxu1 }
 0x1c2   :  { %v234_v15 = vadd.f32 %v254_v13, %v233_v14  ;;  %v235_v16 = vpop.f32.mrb[1].mxu1 }
 0x1c4   :  { %238 = vst.msk [vmem:[#allocation2] sm:$0x3] %vm237_vm3, %v234_v15 }
 0x1c5   :  { %323 = shalt.err (!%p320_p4)
}
 0x1c6   :  { %s324_s30 = scalar_lea.hbm %s532_s5, 32 }
 0x1c7   :  { %p325_p5 = scmp.ne.s32.totalorder %s532_s5, %s324_s30  ;;  %p328_p6 = scmp.lt.u32.totalorder %s324_s30, %s532_s5 }
 0x1c9   :  { %p330_p7 = pnand %p328_p6, %p325_p5 }
 0x1cb   :  { %333 = shalt.err (!%p330_p7)
}
 0x1cc   :  { %248 = dma.vmem_to_hbm [thread:$0]  %s246_s27, 32, %s532_s5, [#allocation3]  }
 0x1cd   :  { %334 = dma.done.wait [#allocation3], 32  }
 0x1ce   :  { %335 = vsyncadd [#allocation3], 4294967264 }
 0x1cf   :  { %252 = vsyncpa [#allocation3], 1 }

</bundles_post_ra>
